<compile_context>
chip_gen: v6e
topology: v6e:2x2x1
jax: 0.10.0
libtpu: 0.0.40
codegen_flags: <defaults>
</compile_context>

<pallas_src>
import jax
import jax.numpy as jnp
from jax.experimental import pallas as pl
from jax.experimental.pallas import tpu as pltpu


def _round_up(n, m):
    return ((n + m - 1) // m) * m


def ffnn_kernel(xT_ref, w1T_ref, b1_ref, w2T_ref, b2_ref, o_ref):
    # Feature-major: batch on the lane axis, features on sublanes.
    xT = xT_ref[...]                                                   # (10, TB) param_dtype
    h = jnp.dot(w1T_ref[...], xT,
                preferred_element_type=jnp.float32)                    # (20, TB) f32 acc
    h = jnp.maximum(h + b1_ref[...], 0.0)                              # bias (20,1) bcast + ReLU, f32
    y = jnp.dot(w2T_ref[...], h,                                       # w2T kept f32; no h downcast
                preferred_element_type=jnp.float32)                    # (1, TB) f32
    o_ref[...] = (y + b2_ref[...]).astype(o_ref.dtype)                 # lane-dense store


def _select_tile(B, block_b, param_itemsize):
    """Pick the batch tile (multiple of 128).

    Cap so the double-buffered footprint (x tile padded to 16 sublanes +
    f32 output tile padded to 8 sublanes, 2 buffers each) stays <= ~40 MiB,
    which leaves headroom even on v7x's 64 MiB physical VMEM.
    """
    per_lane_bytes = 2 * (16 * param_itemsize) + 2 * (8 * 4)           # double-buffered x + out
    vmem_budget = 40 * 1024 * 1024
    tb_cap = max(128, (vmem_budget // per_lane_bytes) // 128 * 128)
    tb = min(block_b, _round_up(max(B, 1), 128), tb_cap)
    return max(tb, 128), per_lane_bytes


def feedforward_nn_fm(xT, w1, b1, w2, b2, *, block_b=None, param_dtype=jnp.float32):
    """Feature-major forward pass: xT (10, B) -> (1, B) f32.

    w1: (10, 20), b1: (20,) or (1, 20), w2: (20, 1), b2: (1,) or (1, 1).
    param_dtype: dtype x and w1 are streamed in (f32 or bf16; bf16 is a pure
    DMA-bytes win on v5e/v6e/v7x alike). h, w2, biases, accumulation and the
    output stay f32.
    """
    d_in, B = xT.shape
    d_hidden = w1.shape[1]
    itemsize = jnp.dtype(param_dtype).itemsize

    if block_b is None:
        block_b = 131072 if itemsize == 2 else 65536
    assert block_b % 128 == 0

    tb, per_lane_bytes = _select_tile(B, block_b, itemsize)
    b_pad = _round_up(max(B, 1), tb)
    grid = (b_pad // tb,)

    # Stream x in param_dtype; pad ragged batch tail with zeros (finite garbage,
    # sliced off below). No transpose: feature-major is the contract here.
    xTc = xT.astype(param_dtype)
    if b_pad != B:
        xTc = jnp.pad(xTc, ((0, 0), (0, b_pad - B)))

    w1T = w1.T.astype(param_dtype)                                     # (20, 10) streamed dtype
    w2T = w2.T.astype(jnp.float32)                                     # (1, 20)  f32 (80 B, keep precision)
    b1c = jnp.asarray(b1, jnp.float32).reshape(d_hidden, 1)            # (20, 1)  f32
    b2c = jnp.asarray(b2, jnp.float32).reshape(1, 1)                   # (1, 1)   f32

    # Scoped VMEM sized to the actual tile (+ headroom for weights/biases).
    vmem_limit = min(int(tb * per_lane_bytes) + (4 << 20), 48 << 20)
    vmem_limit = max(vmem_limit, 32 << 20)

    out = pl.pallas_call(
        ffnn_kernel,
        out_shape=jax.ShapeDtypeStruct((1, b_pad), jnp.float32),
        grid_spec=pltpu.PrefetchScalarGridSpec(
            num_scalar_prefetch=0,
            grid=grid,
            in_specs=[
                pl.BlockSpec((d_in, tb), lambda i: (0, i)),            # streamed x tile
                pl.BlockSpec(w1T.shape, lambda i: (0, 0)),             # VMEM-resident params
                pl.BlockSpec(b1c.shape, lambda i: (0, 0)),
                pl.BlockSpec(w2T.shape, lambda i: (0, 0)),
                pl.BlockSpec(b2c.shape, lambda i: (0, 0)),
            ],
            out_specs=pl.BlockSpec((1, tb), lambda i: (0, i)),         # lane-dense output
        ),
        compiler_params=pltpu.CompilerParams(
            dimension_semantics=("parallel",),
            vmem_limit_bytes=vmem_limit,
        ),
    )(xTc, w1T, b1c, w2T, b2c)

    return out[:, :B]                                                  # (1, B) f32


def feedforward_nn(x, w1, b1, w2, b2, **kwargs):
    """Batch-major convenience wrapper: x (B, 10) -> (B, 1) f32.

    Prefer `feedforward_nn_fm` when the caller can supply feature-major x:
    this wrapper's x.T is a separate HBM pass that can dominate end-to-end
    time for this memory-bound op.
    """
    yT = feedforward_nn_fm(x.T, w1, b1, w2, b2, **kwargs)
    return yT.T


def init_params(key):
    # Deterministic init mimicking nn.Linear default: U(-1/sqrt(fan_in), +1/sqrt(fan_in))
    k1, k2, k3, k4 = jax.random.split(key, 4)
    lim1 = 1.0 / jnp.sqrt(10.0)
    lim2 = 1.0 / jnp.sqrt(20.0)
    w1 = jax.random.uniform(k1, (10, 20), jnp.float32, -lim1, lim1)  # transposed vs torch [out,in]
    b1 = jax.random.uniform(k2, (1, 20), jnp.float32, -lim1, lim1)
    w2 = jax.random.uniform(k3, (20, 1), jnp.float32, -lim2, lim2)
    b2 = jax.random.uniform(k4, (1, 1), jnp.float32, -lim2, lim2)
    return w1, b1, w2, b2


if __name__ == "__main__":
    key = jax.random.PRNGKey(0)
    kx, kp = jax.random.split(key)
    B = 8
    x = jax.random.normal(kx, (B, 10), jnp.float32)
    w1, b1, w2, b2 = init_params(kp)

    ref = jnp.maximum(x @ w1 + b1, 0.0) @ w2 + b2

    # f32, feature-major primary API (single 128-wide tile at this small B).
    out_fm = jax.block_until_ready(feedforward_nn_fm(x.T, w1, b1, w2, b2))
    assert out_fm.shape == (1, B)
    assert jnp.allclose(out_fm.T, ref, atol=1e-5, rtol=1e-5)

    # Batch-major convenience wrapper.
    out = jax.block_until_ready(feedforward_nn(x, w1, b1, w2, b2))
    assert out.shape == (B, 1)
    assert jnp.allclose(out, ref, atol=1e-5, rtol=1e-5)

    # Multi-tile + ragged-batch path: B=300 -> padded to 384, 3 tiles of 128.
    B2 = 300
    x2 = jax.random.normal(jax.random.PRNGKey(1), (B2, 10), jnp.float32)
    ref2 = jnp.maximum(x2 @ w1 + b1, 0.0) @ w2 + b2
    out2 = jax.block_until_ready(
        feedforward_nn_fm(x2.T, w1, b1, w2, b2, block_b=128))
    assert out2.shape == (1, B2)
    assert jnp.allclose(out2.T, ref2, atol=1e-5, rtol=1e-5)

    # bf16 streaming of x/w1 (valid on v5e/v6e/v7x); h/w2/bias/accum stay f32.
    out_bf16 = jax.block_until_ready(
        feedforward_nn_fm(x.T, w1, b1, w2, b2, param_dtype=jnp.bfloat16))
    assert jnp.allclose(out_bf16.T, ref, atol=5e-2, rtol=5e-2)

    print("KERNEL_OK")
</pallas_src>

<mosaic_0001>
module attributes {stable_mosaic.version = 11 : i64} {
  func.func @ffnn_kernel(%arg0: i32, %arg1: memref<10x128xf32, #tpu.memory_space<vmem>>, %arg2: memref<20x10xf32, #tpu.memory_space<vmem>>, %arg3: memref<20x1xf32, #tpu.memory_space<vmem>>, %arg4: memref<1x20xf32, #tpu.memory_space<vmem>>, %arg5: memref<1x1xf32, #tpu.memory_space<vmem>>, %arg6: memref<1x128xf32, #tpu.memory_space<vmem>>) attributes {dimension_semantics = [#tpu.dimension_semantics<parallel>], iteration_bounds = array<i64: 1>, scalar_prefetch = 0 : i64, scratch_operands = 0 : i64, tpu.core_type = #tpu.core_type<tc>, window_params = [{transform_indices = @transform_0, window_bounds = array<i64: 10, 128>}, {pipeline_mode = #tpu.pipeline_mode<synchronous>, transform_indices = @transform_1, window_bounds = array<i64: 20, 10>}, {pipeline_mode = #tpu.pipeline_mode<synchronous>, transform_indices = @transform_2, window_bounds = array<i64: 20, 1>}, {pipeline_mode = #tpu.pipeline_mode<synchronous>, transform_indices = @transform_3, window_bounds = array<i64: 1, 20>}, {pipeline_mode = #tpu.pipeline_mode<synchronous>, transform_indices = @transform_4, window_bounds = array<i64: 1, 1>}, {transform_indices = @transform_5, window_bounds = array<i64: 1, 128>}]} {
    %c0 = arith.constant 0 : index
    %c0_0 = arith.constant 0 : index
    %0 = vector.load %arg1[%c0, %c0_0] : memref<10x128xf32, #tpu.memory_space<vmem>>, vector<10x128xf32>
    %c0_1 = arith.constant 0 : index
    %c0_2 = arith.constant 0 : index
    %1 = vector.load %arg2[%c0_1, %c0_2] : memref<20x10xf32, #tpu.memory_space<vmem>>, vector<20x10xf32>
    %cst = arith.constant dense<0.000000e+00> : vector<20x128xf32>
    %2 = tpu.matmul %1, %0, %cst {dimension_numbers = #tpu.dot_dimension_numbers<[1], [0], [0], [1], [0, 0, 1, 1], [], []>} : vector<20x10xf32>, vector<10x128xf32>, vector<20x128xf32> -> vector<20x128xf32>
    %c0_3 = arith.constant 0 : index
    %c0_4 = arith.constant 0 : index
    %3 = vector.load %arg3[%c0_3, %c0_4] : memref<20x1xf32, #tpu.memory_space<vmem>>, vector<20x1xf32>
    %4 = vector.broadcast %3 : vector<20x1xf32> to vector<20x128xf32>
    %5 = arith.addf %2, %4 : vector<20x128xf32>
    %cst_5 = arith.constant 0.000000e+00 : f32
    %6 = vector.broadcast %cst_5 : f32 to vector<20x128xf32>
    %7 = arith.maximumf %5, %6 : vector<20x128xf32>
    %c0_6 = arith.constant 0 : index
    %c0_7 = arith.constant 0 : index
    %8 = vector.load %arg4[%c0_6, %c0_7] : memref<1x20xf32, #tpu.memory_space<vmem>>, vector<1x20xf32>
    %cst_8 = arith.constant dense<0.000000e+00> : vector<1x128xf32>
    %9 = tpu.matmul %8, %7, %cst_8 {dimension_numbers = #tpu.dot_dimension_numbers<[1], [0], [0], [1], [0, 0, 1, 1], [], []>} : vector<1x20xf32>, vector<20x128xf32>, vector<1x128xf32> -> vector<1x128xf32>
    %c0_9 = arith.constant 0 : index
    %c0_10 = arith.constant 0 : index
    %10 = vector.load %arg5[%c0_9, %c0_10] : memref<1x1xf32, #tpu.memory_space<vmem>>, vector<1x1xf32>
    %11 = vector.broadcast %10 : vector<1x1xf32> to vector<1x128xf32>
    %12 = arith.addf %9, %11 : vector<1x128xf32>
    %c0_11 = arith.constant 0 : index
    %c0_12 = arith.constant 0 : index
    %13 = vector.load %arg6[%c0_11, %c0_12] : memref<1x128xf32, #tpu.memory_space<vmem>>, vector<1x128xf32>
    tpu.vector_store %arg6[%c0_11, %c0_12], %12 {strides = array<i32>} : memref<1x128xf32, #tpu.memory_space<vmem>>, vector<1x128xf32>,
    return
  }
  func.func @transform_0(%arg0: i32) -> (i32, i32) {
    %c0_i32 = arith.constant 0 : i32
    %c0_i32_0 = arith.constant 0 : i32
    return %c0_i32, %arg0 : i32, i32
  }
  func.func @transform_1(%arg0: i32) -> (i32, i32) {
    %c0_i32 = arith.constant 0 : i32
    %c0_i32_0 = arith.constant 0 : i32
    %c0_i32_1 = arith.constant 0 : i32
    return %c0_i32, %c0_i32_0 : i32, i32
  }
  func.func @transform_2(%arg0: i32) -> (i32, i32) {
    %c0_i32 = arith.constant 0 : i32
    %c0_i32_0 = arith.constant 0 : i32
    %c0_i32_1 = arith.constant 0 : i32
    return %c0_i32, %c0_i32_0 : i32, i32
  }
  func.func @transform_3(%arg0: i32) -> (i32, i32) {
    %c0_i32 = arith.constant 0 : i32
    %c0_i32_0 = arith.constant 0 : i32
    %c0_i32_1 = arith.constant 0 : i32
    return %c0_i32, %c0_i32_0 : i32, i32
  }
  func.func @transform_4(%arg0: i32) -> (i32, i32) {
    %c0_i32 = arith.constant 0 : i32
    %c0_i32_0 = arith.constant 0 : i32
    %c0_i32_1 = arith.constant 0 : i32
    return %c0_i32, %c0_i32_0 : i32, i32
  }
  func.func @transform_5(%arg0: i32) -> (i32, i32) {
    %c0_i32 = arith.constant 0 : i32
    %c0_i32_0 = arith.constant 0 : i32
    return %c0_i32, %arg0 : i32, i32
  }
}

</mosaic_0001>

<bundles_post_ra>
// kernel: tpu_custom_call.1
= control target key start
LH: loop header
LB: loop body
LE: loop exit
PB: predicated region body
PF: predicated region fallthrough
CT: control target
= control target key end

     0   :  { %s386_s0 = inlined_call_operand.vmem [shape: f32[10,128], index: 0, kind: input, shape index: {}]   ;;  %s387_s1 = inlined_call_operand.vmem [shape: f32[20,10], index: 1, kind: input, shape index: {}]   ;;  %s388_s2 = inlined_call_operand.vmem [shape: f32[20,1], index: 2, kind: input, shape index: {}]   ;;  %s389_s3 = inlined_call_operand.vmem [shape: f32[1,20], index: 3, kind: input, shape index: {}]   ;;  %s390_s4 = inlined_call_operand.<no memory space> [shape: f32[1,1], index: 4, kind: input, shape index: {}]   ;;  %s391_s5 = inlined_call_operand.hbm [shape: f32[1,128], index: 5, kind: output, shape index: {}]  }
   0x1   :  { %v10_v0 = vstv %s390_s4 }
   0x2   :  { %11 = vst [vmem:[#allocation2] sm:$0x1] %v10_v0 }
   0x3   :  { %v24_v1 = vld [vmem:[%s386_s0 + $0x8] sm:$0x3]  ;;  %vm56_vm0 = vcmask 1041408   ;;  %v312_v2 = vmov 0.0   ;;  %v23_v3 = vld [vmem:[%s386_s0] sm:$0xff]  ;;  %vm313_vm1 = vmmov 0  }
   0x4   :  { %262 = vmatprep.subr.mxu0 %v312_v2  ;;  %266 = vmatprep.mubr.msk.f32.mxu0 %vm313_vm1, %v312_v2  ;;  %v25_v4 = vld [vmem:[%s387_s1] sm:$0xff]  ;;  %vm46_vm2 = vcmask 80896   ;;  %v314_v5 = vmov 0   ;;  %v30_v6 = vld [vmem:[%s388_s2 + $0x10] sm:$0xf] }
   0x5   :  { %263 = vmatpush3.msk.msra.mxu0 %vm56_vm0, %v24_v1  ;;  %289 = vset.pattern.permute.xlu1 %v314_v5  ;;  %v28_v7 = vld [vmem:[%s388_s2] sm:$0xff] }
   0x6   :  { %264 = vmatprep.subr.mxu0 %v312_v2  ;;  %288 = vset.pattern.permute.xlu0 %v314_v5 }
   0x7   :  { %12 = vsyncpa [#allocation4], 0  ;;  %265 = vmatpush3.msra.mxu0 %v23_v3  ;;  %43 = vperm.xlu0 %288, %v30_v6   ;;  %v29_v8 = vld [vmem:[%s388_s2 + $0x8] sm:$0xff]  ;;  %v27_v11 = vld [vmem:[%s387_s1 + $0x10] sm:$0xf]  ;;  %vm158_vm3 = vcmask 1043456   ;;  %v150_v28 = vlaneseq }
   0x8   :  { %267 = vmatmul.mubr.msk.f32.vlgmr.msra.gmra.mxu0 %vm46_vm2, %v25_v4  ;;  %33 = vperm.xlu1 %289, %v28_v7   ;;  %v26_v9 = vld [vmem:[%s387_s1 + $0x8] sm:$0xff]  ;;  %v143_v27 = vld [vmem:[%s389_s3] sm:$0x1]  ;;  %vm154_vm4 = vcmask 162816   ;;  %s315_s9 = smov [#allocation3]  }
   0x9   :  { %269 = vmatprep.mubr.msk.f32.mxu0 %vm313_vm1, %v312_v2  ;;  %v144_v10 = vld [vmem:[#allocation2] sm:$0x1]  ;;  %275 = vmatprep.subr.mxu1 %v312_v2  ;;  %v151_v29 = vshrl.u32 %v150_v28, 7  ;;  %s239_s10 = sshll.u32 %s315_s9, 4  ;;  %s240_s10 = int_to_ptr.vmem [resolvable:$true] %s239_s10 }
   0xa   :  { %281 = vmatprep.mubr.msk.f32.mxu1 %vm313_vm1, %v312_v2  ;;  %s290_s11 = scalar_lea.vmem %s240_s10, 16  ;;  %s294_s12 = scalar_lea.vmem %s240_s10, 32 }
   0xb   :  { %38 = vperm.xlu0 %288, %v29_v8   ;;  %v152_v30 = vsub.s32 0, %v151_v29  ;;  %p291_p0 = scmp.ne.s32.totalorder %s240_s10, %s290_s11  ;;  %p295_p1 = scmp.lt.s32.totalorder %s240_s10, %s240_s10 }
   0xc   :  { %270 = vmatmul.mubr.msk.f32.gmra.mxu0 %vm46_vm2, %v26_v9  ;;  %147 = vperm.xlu1 %289, %v144_v10   ;;  %p296_p2 = scmp.lt.s32.totalorder %s294_s12, %s290_s11 }
   0xd   :  { %272 = vmatprep.mubr.msk.f32.mxu0 %vm313_vm1, %v312_v2 }
   0xe   :  { %p297_p3 = por %p296_p2, %p295_p1 }
  0x10   :  { %273 = vmatmul.mubr.msk.f32.gmra.mxu0 %vm46_vm2, %v27_v11  ;;  %p298_p4 = pnand %p297_p3, %p291_p0 }
  0x82   :  { %v44_v12 = vpop.permute.xlu0 %43 }
  0x83   :  { %v34_v18 = vpop.permute.xlu1 %33 }
  0x86   :  { %v39_v16 = vpop.permute.xlu0 %38 }
  0x87   :  { %v148_v31 = vpop.permute.xlu1 %147 }
  0x88   :  { %v153_v32 = vrot.slane %v148_v31, %v152_v30 }
  0xc8   :  { %v126_v13 = vpop.f32.mrf.mxu0 }
  0xc9   :  { %v127_v23 = vadd.f32 %v126_v13, %v34_v18 }
  0xca   :  { %v268_v14 = vpop.f32.mrf.mxu0 }
  0xcb   :  { %v140_v26 = vmax.f32 %v127_v23, 0.0 }
  0xcc   :  { %v131_v15 = vpop.f32.mrf.mxu0 }
  0xcd   :  { %v132_v20 = vadd.f32 %v131_v15, %v39_v16 }
  0xce   :  { %v271_v17 = vpop.f32.mrf.mxu0 }
  0xcf   :  { %v141_v25 = vmax.f32 %v132_v20, 0.0 }
  0xd0   :  { %v136_v19 = vpop.f32.mrf.mxu0 }
  0xd1   :  { %v137_v21 = vadd.f32 %v136_v19, %v44_v12 }
  0xd2   :  { %v274_v22 = vpop.f32.mrf.mxu0 }
  0xd3   :  { %v142_v24 = vmax.f32 %v137_v21, 0.0 }
  0xd5   :  { %276 = vmatpush3.msk.msra.mxu1 %vm158_vm3, %v142_v24 }
  0xd6   :  { %277 = vmatprep.subr.mxu1 %v312_v2 }
  0xd7   :  { %278 = vmatpush3.msra.mxu1 %v141_v25 }
  0xd8   :  { %279 = vmatprep.subr.mxu1 %v312_v2 }
  0xd9   :  { %280 = vmatpush3.msra.mxu1 %v140_v26 }
  0xda   :  { %282 = vmatmul.mubr.msk.f32.vlgmr.msra.gmra.mxu1 %vm154_vm4, %v143_v27 }
 0x19a   :  { %v228_v33 = vpop.f32.mrf.mxu1 }
 0x19b   :  { %v229_v34 = vadd.f32 %v228_v33, %v153_v32 }
 0x19c   :  { %v283_v35 = vpop.f32.mrf.mxu1 }
 0x19d   :  { %232 = vst [vmem:[#allocation3] sm:$0x1] %v229_v34 }
 0x19e   :  { %301 = shalt.err (!%p298_p4)
}
 0x19f   :  { %242 = dma.vmem_to_hbm [thread:$0]  %s240_s10, 16, %s391_s5, [#allocation4]  }
 0x1a0   :  { %310 = dma.done.wait [#allocation4], 16  }
 0x1a1   :  { %311 = vsyncadd [#allocation4], 4294967280 }
 0x1a2   :  { %246 = vsyncpa [#allocation4], 1 }

</bundles_post_ra>
